<compile_context>
chip_gen: v7x
topology: tpu7x:2x2x1
jax: 0.10.0
libtpu: 0.0.40
codegen_flags: <defaults>
</compile_context>

<pallas_src>
import math

import jax
import jax.numpy as jnp
from jax.experimental import pallas as pl
from jax.experimental.pallas import tpu as pltpu

HID = 256


def critic_kernel(state_ref, action_ref,
                  w1s_ref, w1a_ref, w2_ref, b12_ref, w3_ref,  # weights
                  b3_ref,                                      # SMEM scalar bias
                  q_ref):
    # bf16 MXU operands, f32 accumulation.
    s = state_ref[...].astype(jnp.bfloat16)
    a = action_ref[...].astype(jnp.bfloat16)

    b1 = b12_ref[0:1, :]   # (1, HID) f32
    b2 = b12_ref[1:2, :]   # (1, HID) f32

    # h1 = relu(cat([state, action], 1) @ W1 + b1)  (split matmuls)
    h1 = jnp.maximum(
        jnp.dot(s, w1s_ref[...], preferred_element_type=jnp.float32)
        + jnp.dot(a, w1a_ref[...], preferred_element_type=jnp.float32)
        + b1, 0.0)

    # h2 = relu(h1 @ W2 + b2)
    h2 = jnp.maximum(
        jnp.dot(h1.astype(jnp.bfloat16), w2_ref[...],
                preferred_element_type=jnp.float32) + b2, 0.0)

    # q = h2 @ w3 + b3  -> N=1 head: VPU multiply + lane reduction (skip MXU).
    q = jnp.sum(h2 * w3_ref[...], axis=-1, keepdims=True) + b3_ref[0]

    q_ref[...] = q


def _round_up(x, m):
    return ((x + m - 1) // m) * m


def init_linear(key, fan_in, fan_out):
    """PyTorch nn.Linear default init: U(-1/sqrt(fan_in), 1/sqrt(fan_in))."""
    kw, kb = jax.random.split(key)
    bound = 1.0 / math.sqrt(float(fan_in))
    w = jax.random.uniform(kw, (fan_in, fan_out), jnp.float32, -bound, bound)
    b = jax.random.uniform(kb, (fan_out,), jnp.float32, -bound, bound)
    return w, b


def make_params(key, state_dim, action_dim):
    k1, k2, k3 = jax.random.split(key, 3)
    w1, b1 = init_linear(k1, state_dim + action_dim, HID)   # l1 (on concat input)
    w2, b2 = init_linear(k2, HID, HID)                      # l2
    w3, b3 = init_linear(k3, HID, 1)                        # l3

    # Weights pre-transposed to (in, out); MXU operands stored in bf16.
    w1s = w1[:state_dim, :].astype(jnp.bfloat16)            # (S, 256)
    w1a = w1[state_dim:, :].astype(jnp.bfloat16)            # (A, 256)
    w2b = w2.astype(jnp.bfloat16)                           # (256, 256)
    b12 = jnp.stack([b1, b2], axis=0)                       # (2, 256) f32
    w3_row = jnp.transpose(w3)                              # (1, 256) f32 (VPU head)
    return (w1s, w1a, w2b, b12, w3_row, b3)                 # b3: (1,) f32


def critic_forward(state, action, params, block_b=512):
    w1s, w1a, w2, b12, w3, b3 = params
    B, state_dim = state.shape
    action_dim = action.shape[1]
    in_dim = state_dim + action_dim

    # Batch tile: multiple of 8 sublanes, capped by block_b.
    TB = min(block_b, _round_up(B, 8))
    B_pad = _round_up(B, TB)
    if B_pad != B:
        pad = B_pad - B
        state = jnp.pad(state, ((0, pad), (0, 0)))
        action = jnp.pad(action, ((0, pad), (0, 0)))
    grid = (B_pad // TB,)

    cost = pl.CostEstimate(
        flops=int(2 * B_pad * (in_dim * HID + HID * HID + HID)),
        transcendentals=0,
        bytes_accessed=int(B_pad * (in_dim + 1) * 4
                           + (in_dim * HID + HID * HID) * 2
                           + (3 * HID + 1) * 4),
    )

    const_spec = lambda shape: pl.BlockSpec(shape, lambda i: (0, 0))

    q_pad = pl.pallas_call(
        critic_kernel,
        out_shape=jax.ShapeDtypeStruct((B_pad, 1), jnp.float32),
        grid=grid,
        in_specs=[
            pl.BlockSpec((TB, state_dim), lambda i: (i, 0)),    # state tile
            pl.BlockSpec((TB, action_dim), lambda i: (i, 0)),   # action tile
            const_spec((state_dim, HID)),                        # w1s (resident)
            const_spec((action_dim, HID)),                       # w1a (resident)
            const_spec((HID, HID)),                              # w2  (resident)
            const_spec((2, HID)),                                # b1/b2 packed
            const_spec((1, HID)),                                # w3 row (VPU head)
            pl.BlockSpec(memory_space=pltpu.MemorySpace.SMEM),   # b3 scalar
        ],
        out_specs=pl.BlockSpec((TB, 1), lambda i: (i, 0)),
        compiler_params=pltpu.CompilerParams(
            dimension_semantics=("parallel",)),
        cost_estimate=cost,
    )(state, action, w1s, w1a, w2, b12, w3, b3)

    return q_pad[:B]


def critic_reference(state, action, params):
    """Pure-JAX reference (f32 math on the same bf16-rounded weights)."""
    w1s, w1a, w2, b12, w3, b3 = params
    h1 = jax.nn.relu(state @ w1s.astype(jnp.float32)
                     + action @ w1a.astype(jnp.float32) + b12[0:1])
    h2 = jax.nn.relu(h1 @ w2.astype(jnp.float32) + b12[1:2])
    return jnp.sum(h2 * w3, axis=-1, keepdims=True) + b3[0]


if __name__ == "__main__":
    state_dim, action_dim, batch = 16, 8, 8
    key = jax.random.PRNGKey(0)
    k_params, k_state, k_action = jax.random.split(key, 3)

    params = make_params(k_params, state_dim, action_dim)
    state = jax.random.normal(k_state, (batch, state_dim), jnp.float32)
    action = jax.random.normal(k_action, (batch, action_dim), jnp.float32)

    q = critic_forward(state, action, params)
    jax.block_until_ready(q)

    q_ref = critic_reference(state, action, params)
    assert q.shape == (batch, 1)
    # bf16 MXU operands -> loosened tolerance vs. the f32 reference.
    assert jnp.allclose(q, q_ref, rtol=2e-2, atol=2e-2)

    print("KERNEL_OK")
</pallas_src>

<mosaic_0001>
module attributes {stable_mosaic.version = 11 : i64} {
  func.func @critic_kernel(%arg0: i32, %arg1: memref<8x16xf32, #tpu.memory_space<vmem>>, %arg2: memref<8x8xf32, #tpu.memory_space<vmem>>, %arg3: memref<16x256xbf16, #tpu.memory_space<vmem>>, %arg4: memref<8x256xbf16, #tpu.memory_space<vmem>>, %arg5: memref<256x256xbf16, #tpu.memory_space<vmem>>, %arg6: memref<2x256xf32, #tpu.memory_space<vmem>>, %arg7: memref<1x256xf32, #tpu.memory_space<vmem>>, %arg8: memref<1xf32, #tpu.memory_space<smem>>, %arg9: memref<8x1xf32, #tpu.memory_space<vmem>>) attributes {dimension_semantics = [#tpu.dimension_semantics<parallel>], iteration_bounds = array<i64: 1>, scalar_prefetch = 0 : i64, scratch_operands = 0 : i64, tpu.core_type = #tpu.core_type<tc>, window_params = [{transform_indices = @transform_0, window_bounds = array<i64: 8, 16>}, {transform_indices = @transform_1, window_bounds = array<i64: 8, 8>}, {pipeline_mode = #tpu.pipeline_mode<synchronous>, transform_indices = @transform_2, window_bounds = array<i64: 16, 256>}, {pipeline_mode = #tpu.pipeline_mode<synchronous>, transform_indices = @transform_3, window_bounds = array<i64: 8, 256>}, {pipeline_mode = #tpu.pipeline_mode<synchronous>, transform_indices = @transform_4, window_bounds = array<i64: 256, 256>}, {pipeline_mode = #tpu.pipeline_mode<synchronous>, transform_indices = @transform_5, window_bounds = array<i64: 2, 256>}, {pipeline_mode = #tpu.pipeline_mode<synchronous>, transform_indices = @transform_6, window_bounds = array<i64: 1, 256>}, {transform_indices = @transform_7, window_bounds = array<i64: 1>}, {transform_indices = @transform_8, window_bounds = array<i64: 8, 1>}]} {
    %c0 = arith.constant 0 : index
    %c0_0 = arith.constant 0 : index
    %0 = vector.load %arg1[%c0, %c0_0] : memref<8x16xf32, #tpu.memory_space<vmem>>, vector<8x16xf32>
    %1 = arith.truncf %0 : vector<8x16xf32> to vector<8x16xbf16>
    %c0_1 = arith.constant 0 : index
    %c0_2 = arith.constant 0 : index
    %2 = vector.load %arg2[%c0_1, %c0_2] : memref<8x8xf32, #tpu.memory_space<vmem>>, vector<8x8xf32>
    %3 = arith.truncf %2 : vector<8x8xf32> to vector<8x8xbf16>
    %c0_3 = arith.constant 0 : index
    %c0_4 = arith.constant 0 : index
    %4 = vector.load %arg6[%c0_3, %c0_4] : memref<2x256xf32, #tpu.memory_space<vmem>>, vector<1x256xf32>
    %c1 = arith.constant 1 : index
    %c0_5 = arith.constant 0 : index
    %5 = vector.load %arg6[%c1, %c0_5] : memref<2x256xf32, #tpu.memory_space<vmem>>, vector<1x256xf32>
    %c0_6 = arith.constant 0 : index
    %c0_7 = arith.constant 0 : index
    %6 = vector.load %arg3[%c0_6, %c0_7] : memref<16x256xbf16, #tpu.memory_space<vmem>>, vector<16x256xbf16>
    %cst = arith.constant dense<0.000000e+00> : vector<8x256xf32>
    %7 = tpu.matmul %1, %6, %cst {dimension_numbers = #tpu.dot_dimension_numbers<[1], [0], [0], [1], [0, 0, 1, 1], [], []>} : vector<8x16xbf16>, vector<16x256xbf16>, vector<8x256xf32> -> vector<8x256xf32>
    %c0_8 = arith.constant 0 : index
    %c0_9 = arith.constant 0 : index
    %8 = vector.load %arg4[%c0_8, %c0_9] : memref<8x256xbf16, #tpu.memory_space<vmem>>, vector<8x256xbf16>
    %cst_10 = arith.constant dense<0.000000e+00> : vector<8x256xf32>
    %9 = tpu.matmul %3, %8, %cst_10 {dimension_numbers = #tpu.dot_dimension_numbers<[1], [0], [0], [1], [0, 0, 1, 1], [], []>} : vector<8x8xbf16>, vector<8x256xbf16>, vector<8x256xf32> -> vector<8x256xf32>
    %10 = arith.addf %7, %9 : vector<8x256xf32>
    %11 = vector.broadcast %4 : vector<1x256xf32> to vector<8x256xf32>
    %12 = arith.addf %10, %11 : vector<8x256xf32>
    %cst_11 = arith.constant 0.000000e+00 : f32
    %13 = vector.broadcast %cst_11 : f32 to vector<8x256xf32>
    %14 = arith.maximumf %12, %13 : vector<8x256xf32>
    %15 = arith.truncf %14 : vector<8x256xf32> to vector<8x256xbf16>
    %c0_12 = arith.constant 0 : index
    %c0_13 = arith.constant 0 : index
    %16 = vector.load %arg5[%c0_12, %c0_13] : memref<256x256xbf16, #tpu.memory_space<vmem>>, vector<256x256xbf16>
    %cst_14 = arith.constant dense<0.000000e+00> : vector<8x256xf32>
    %17 = tpu.matmul %15, %16, %cst_14 {dimension_numbers = #tpu.dot_dimension_numbers<[1], [0], [0], [1], [0, 0, 1, 1], [], []>} : vector<8x256xbf16>, vector<256x256xbf16>, vector<8x256xf32> -> vector<8x256xf32>
    %18 = vector.broadcast %5 : vector<1x256xf32> to vector<8x256xf32>
    %19 = arith.addf %17, %18 : vector<8x256xf32>
    %cst_15 = arith.constant 0.000000e+00 : f32
    %20 = vector.broadcast %cst_15 : f32 to vector<8x256xf32>
    %21 = arith.maximumf %19, %20 : vector<8x256xf32>
    %c0_16 = arith.constant 0 : index
    %c0_17 = arith.constant 0 : index
    %22 = vector.load %arg7[%c0_16, %c0_17] : memref<1x256xf32, #tpu.memory_space<vmem>>, vector<1x256xf32>
    %23 = vector.broadcast %22 : vector<1x256xf32> to vector<8x256xf32>
    %24 = arith.mulf %21, %23 : vector<8x256xf32>
    %cst_18 = arith.constant dense<0.000000e+00> : vector<8xf32>
    %25 = vector.multi_reduction <add>, %24, %cst_18 [1] : vector<8x256xf32> to vector<8xf32>
    %26 = vector.shape_cast %25 : vector<8xf32> to vector<8x1xf32>
    %c0_19 = arith.constant 0 : index
    %27 = memref.load %arg8[%c0_19] : memref<1xf32, #tpu.memory_space<smem>>
    %28 = vector.broadcast %27 : f32 to vector<8x1xf32>
    %29 = arith.addf %26, %28 : vector<8x1xf32>
    %c0_20 = arith.constant 0 : index
    %c0_21 = arith.constant 0 : index
    %30 = vector.load %arg9[%c0_20, %c0_21] : memref<8x1xf32, #tpu.memory_space<vmem>>, vector<8x1xf32>
    tpu.vector_store %arg9[%c0_20, %c0_21], %29 {strides = array<i32>} : memref<8x1xf32, #tpu.memory_space<vmem>>, vector<8x1xf32>,
    return
  }
  func.func @transform_0(%arg0: i32) -> (i32, i32) {
    %c0_i32 = arith.constant 0 : i32
    %c0_i32_0 = arith.constant 0 : i32
    return %arg0, %c0_i32 : i32, i32
  }
  func.func @transform_1(%arg0: i32) -> (i32, i32) {
    %c0_i32 = arith.constant 0 : i32
    %c0_i32_0 = arith.constant 0 : i32
    return %arg0, %c0_i32 : i32, i32
  }
  func.func @transform_2(%arg0: i32) -> (i32, i32) {
    %c0_i32 = arith.constant 0 : i32
    %c0_i32_0 = arith.constant 0 : i32
    %c0_i32_1 = arith.constant 0 : i32
    return %c0_i32, %c0_i32_0 : i32, i32
  }
  func.func @transform_3(%arg0: i32) -> (i32, i32) {
    %c0_i32 = arith.constant 0 : i32
    %c0_i32_0 = arith.constant 0 : i32
    %c0_i32_1 = arith.constant 0 : i32
    return %c0_i32, %c0_i32_0 : i32, i32
  }
  func.func @transform_4(%arg0: i32) -> (i32, i32) {
    %c0_i32 = arith.constant 0 : i32
    %c0_i32_0 = arith.constant 0 : i32
    %c0_i32_1 = arith.constant 0 : i32
    return %c0_i32, %c0_i32_0 : i32, i32
  }
  func.func @transform_5(%arg0: i32) -> (i32, i32) {
    %c0_i32 = arith.constant 0 : i32
    %c0_i32_0 = arith.constant 0 : i32
    %c0_i32_1 = arith.constant 0 : i32
    return %c0_i32, %c0_i32_0 : i32, i32
  }
  func.func @transform_6(%arg0: i32) -> (i32, i32) {
    %c0_i32 = arith.constant 0 : i32
    %c0_i32_0 = arith.constant 0 : i32
    %c0_i32_1 = arith.constant 0 : i32
    return %c0_i32, %c0_i32_0 : i32, i32
  }
  func.func @transform_7(%arg0: i32) -> i32 {
    %c0_i32 = arith.constant 0 : i32
    %c0_i32_0 = arith.constant 0 : i32
    return %c0_i32 : i32
  }
  func.func @transform_8(%arg0: i32) -> (i32, i32) {
    %c0_i32 = arith.constant 0 : i32
    %c0_i32_0 = arith.constant 0 : i32
    return %arg0, %c0_i32 : i32, i32
  }
}

</mosaic_0001>

<bundles_post_ra>
// kernel: tpu_custom_call.1
= control target key start
LH: loop header
LB: loop body
LE: loop exit
PB: predicated region body
PF: predicated region fallthrough
CT: control target
= control target key end

     0   :  { %14 = vsyncpa [#allocation4], 0  ;;  %s808_s0 = inlined_call_operand.hbm [shape: f32[8,16], index: 0, kind: input, shape index: {}]   ;;  %s809_s1 = inlined_call_operand.hbm [shape: f32[8,8], index: 1, kind: input, shape index: {}]   ;;  %s810_s2 = inlined_call_operand.hbm [shape: bf16[16,256], index: 2, kind: input, shape index: {}]   ;;  %s811_s3 = inlined_call_operand.vmem [shape: bf16[8,256], index: 3, kind: input, shape index: {}]   ;;  %s812_s4 = inlined_call_operand.hbm [shape: bf16[256,256], index: 4, kind: input, shape index: {}]   ;;  %s813_s5 = inlined_call_operand.vmem [shape: f32[2,256], index: 5, kind: input, shape index: {}]   ;;  %s814_s6 = inlined_call_operand.vmem [shape: f32[1,256], index: 6, kind: input, shape index: {}]   ;;  %s815_s7 = inlined_call_operand.<no memory space> [shape: f32[1], index: 7, kind: input, shape index: {}]   ;;  %s816_s8 = inlined_call_operand.vmem [shape: f32[8,1], index: 8, kind: output, shape index: {}]  }
   0x1   :  { %15 = vsyncpa [#allocation6], 0 }
   0x2   :  { %16 = vsyncpa [#allocation9], 0  ;;  %s690_s27 = smov [#allocation5]   ;;  %s691_s29 = smov [#allocation3]  }
   0x3   :  { %s33_s28 = sshll.u32 %s690_s27, 4  ;;  %s23_s30 = sshll.u32 %s691_s29, 4  ;;  %s34_s28 = int_to_ptr.vmem [resolvable:$true] %s33_s28  ;;  %s24_s30 = int_to_ptr.vmem [resolvable:$true] %s23_s30 }
   0x4   :  { %s596_s11 = scalar_lea.hbm %s809_s1, 128 }
   0x5   :  { %p597_p0 = scmp.ne.s32.totalorder %s809_s1, %s596_s11  ;;  %p600_p1 = scmp.lt.u32.totalorder %s596_s11, %s809_s1 }
   0x7   :  { %p602_p2 = pnand %p600_p1, %p597_p0 }
   0x9   :  { %605 = shalt.err (!%p602_p2)
}
   0xa   :  { %s606_s16 = scalar_lea.vmem %s34_s28, 128  ;;  %p611_p4 = scmp.lt.s32.totalorder %s34_s28, %s34_s28 }
   0xb   :  { %p607_p3 = scmp.ne.s32.totalorder %s34_s28, %s606_s16  ;;  %p612_p5 = scmp.lt.s32.totalorder %s606_s16, %s606_s16 }
   0xd   :  { %p613_p6 = por %p612_p5, %p611_p4 }
   0xf   :  { %p614_p7 = pnand %p613_p6, %p607_p3 }
  0x11   :  { %617 = shalt.err (!%p614_p7)
}
  0x12   :  { %36 = dma.hbm_to_vmem [thread:$0]  %s809_s1, 128, %s34_s28, [#allocation6]  }
  0x13   :  { %s618_s21 = scalar_lea.hbm %s808_s0, 128 }
  0x14   :  { %p619_p8 = scmp.ne.s32.totalorder %s808_s0, %s618_s21  ;;  %p622_p9 = scmp.lt.u32.totalorder %s618_s21, %s808_s0 }
  0x16   :  { %p624_p10 = pnand %p622_p9, %p619_p8 }
  0x18   :  { %627 = shalt.err (!%p624_p10)
}
  0x19   :  { %s628_s26 = scalar_lea.vmem %s24_s30, 128  ;;  %p633_p12 = scmp.lt.s32.totalorder %s24_s30, %s24_s30 }
  0x1a   :  { %p629_p11 = scmp.ne.s32.totalorder %s24_s30, %s628_s26  ;;  %p634_p13 = scmp.lt.s32.totalorder %s628_s26, %s628_s26 }
  0x1c   :  { %p635_p0 = por %p634_p13, %p633_p12 }
  0x1e   :  { %p636_p1 = pnand %p635_p0, %p629_p11 }
  0x20   :  { %639 = shalt.err (!%p636_p1)
}
  0x21   :  { %26 = dma.hbm_to_vmem [thread:$0]  %s808_s0, 128, %s24_s30, [#allocation4]  }
  0x22   :  { %s692_s28 = smov [#allocation7]   ;;  %s640_s11 = scalar_lea.hbm %s810_s2, 256 }
  0x23   :  { %s42_s29 = sshll.u32 %s692_s28, 4  ;;  %p641_p2 = scmp.ne.s32.totalorder %s810_s2, %s640_s11  ;;  %s43_s29 = int_to_ptr.vmem [resolvable:$true] %s42_s29 }
  0x24   :  { %p644_p3 = scmp.lt.u32.totalorder %s640_s11, %s810_s2 }
  0x26   :  { %p646_p4 = pnand %p644_p3, %p641_p2 }
  0x28   :  { %649 = shalt.err (!%p646_p4)
}
  0x29   :  { %s650_s16 = scalar_lea.vmem %s43_s29, 256  ;;  %p655_p6 = scmp.lt.s32.totalorder %s43_s29, %s43_s29 }
  0x2a   :  { %p651_p5 = scmp.ne.s32.totalorder %s43_s29, %s650_s16  ;;  %p656_p7 = scmp.lt.s32.totalorder %s650_s16, %s650_s16 }
  0x2c   :  { %p657_p8 = por %p656_p7, %p655_p6 }
  0x2e   :  { %p658_p9 = pnand %p657_p8, %p651_p5 }
  0x30   :  { %661 = shalt.err (!%p658_p9)
}
  0x31   :  { %s693_s0 = smov 128   ;;  %s694_s30 = smov 8  }
  0x32   :  { %48 = dma.hbm_to_vmem [thread:$0]  %s810_s2, 256, %s43_s29, [#allocation6], %s693_s0, %s693_s0, %s694_s30  }
  0x33   :  { %s695_s19 = smov [#allocation8]   ;;  %s662_s23 = scalar_lea.hbm %s812_s4, 4096 }
  0x34   :  { %s56_s20 = sshll.u32 %s695_s19, 4  ;;  %p663_p10 = scmp.ne.s32.totalorder %s812_s4, %s662_s23  ;;  %s57_s20 = int_to_ptr.vmem [resolvable:$true] %s56_s20 }
  0x35   :  { %p666_p11 = scmp.lt.u32.totalorder %s662_s23, %s812_s4 }
  0x37   :  { %p668_p12 = pnand %p666_p11, %p663_p10 }
  0x39   :  { %671 = shalt.err (!%p668_p12)
}
  0x3a   :  { %s672_s27 = scalar_lea.vmem %s57_s20, 4096  ;;  %p677_p0 = scmp.lt.s32.totalorder %s57_s20, %s57_s20 }
  0x3b   :  { %p673_p13 = scmp.ne.s32.totalorder %s57_s20, %s672_s27  ;;  %p678_p1 = scmp.lt.s32.totalorder %s672_s27, %s672_s27 }
  0x3d   :  { %p679_p2 = por %p678_p1, %p677_p0 }
  0x3f   :  { %p680_p3 = pnand %p679_p2, %p673_p13 }
  0x41   :  { %683 = shalt.err (!%p680_p3)
}
  0x42   :  { %62 = dma.hbm_to_vmem [thread:$0]  %s812_s4, 4096, %s57_s20, [#allocation9], %s693_s0, %s693_s0, %s694_s30  }
  0x43   :  { %684 = dma.done.wait [#allocation4], 128  }
  0x44   :  { %685 = vsyncadd [#allocation4], 4294967168 }
  0x45   :  { %686 = dma.done.wait [#allocation6], 384  }
  0x46   :  { %687 = vsyncadd [#allocation6], 4294966912 }
  0x47   :  { %688 = dma.done.wait [#allocation9], 4096  }
  0x48   :  { %689 = vsyncadd [#allocation9], 4294963200  ;;  %v696_v0 = vmov 0   ;;  %v91_v1 = vld [vmem:[%s811_s3] sm:$0xff]  ;;  %vm101_vm0 = vcmask 1043456   ;;  %v84_v2 = vld [vmem:[#allocation5] sm:$0xff]  ;;  %v205_v43 = vlaneseq }
  0x49   :  { %140 = vmatprep.mubr.bf16.mxu1 %v696_v0  ;;  %v498_v3 = vcombine.high %v91_v1, %v91_v1  ;;  %v497_v4 = vcombine.low %v91_v1, %v91_v1  ;;  %v547_v5 = vld [vmem:[#allocation7 + $0x4] ss:$8 sps:$4 sm:$0xff]   ;;  %v85_v7 = vpack.c.bf16 %v84_v2, %v84_v2  ;;  %v548_v8 = vld [vmem:[#allocation8 + $0x4] ss:$8 sps:$4 sm:$0xff]   ;;  %v550_v9 = vld [vmem:[#allocation8] ss:$8 sps:$4 sm:$0xff]  }
  0x4a   :  { %vm97_vm1 = vcmask 64512   ;;  %v545_v10 = vld [vmem:[#allocation7] ss:$8 sps:$4 sm:$0xff]   ;;  %v551_v11 = vld [vmem:[#allocation8 + $0x14] ss:$8 sps:$4 sm:$0xff]   ;;  %424 = vmatprep.subr.bf16.mxu0 %v548_v8  ;;  %v82_v14 = vld [vmem:[#allocation3] sm:$0xff] }
  0x4b   :  { %499 = vmatprep.subr.msk.bf16.mxu1 %vm101_vm0, %v498_v3  ;;  %v103_v6 = vsel %vm101_vm0, %v497_v4, 0  ;;  %425 = vmatpush1.bf16.msra.mxu0 %v550_v9  ;;  %v553_v12 = vld [vmem:[#allocation8 + $0x10] ss:$8 sps:$4 sm:$0xff]   ;;  %v554_v13 = vld [vmem:[#allocation8 + $0x24] ss:$8 sps:$4 sm:$0xff]   ;;  %v83_v16 = vpack.c.bf16 %v82_v14, %v82_v14  ;;  %vm159_vm2 = vcmask 130048  }
  0x4c   :  { %109 = vmatpush1.bf16.msra.mxu1 %v103_v6  ;;  %426 = vmatprep.subr.bf16.mxu0 %v551_v11  ;;  %v556_v15 = vld [vmem:[#allocation8 + $0x20] ss:$8 sps:$4 sm:$0xff]   ;;  %v557_v17 = vld [vmem:[#allocation8 + $0x34] ss:$8 sps:$4 sm:$0xff]   ;;  %v559_v18 = vld [vmem:[#allocation8 + $0x30] ss:$8 sps:$4 sm:$0xff]  }
  0x4d   :  { %163 = vmatprep.subr.bf16.mxu1 %v547_v5  ;;  %v560_v19 = vld [vmem:[#allocation8 + $0x44] ss:$8 sps:$4 sm:$0xff]   ;;  %v562_v20 = vld [vmem:[#allocation8 + $0x40] ss:$8 sps:$4 sm:$0xff]   ;;  %v563_v21 = vld [vmem:[#allocation8 + $0x54] ss:$8 sps:$4 sm:$0xff]  }
  0x4e   :  { %v565_v22 = vld [vmem:[#allocation8 + $0x50] ss:$8 sps:$4 sm:$0xff]   ;;  %v566_v23 = vld [vmem:[#allocation8 + $0x64] ss:$8 sps:$4 sm:$0xff]   ;;  %v568_v24 = vld [vmem:[#allocation8 + $0x60] ss:$8 sps:$4 sm:$0xff]  }
  0x4f   :  { %500 = vmatmul.mubr.msk.bf16.vlgmr.msra.gmra.mrb[0].mxu1 %vm97_vm1, %v85_v7  ;;  %427 = vmatpush1.bf16.msra.mxu0 %v553_v12  ;;  %v569_v25 = vld [vmem:[#allocation8 + $0x74] ss:$8 sps:$4 sm:$0xff]   ;;  %v571_v26 = vld [vmem:[#allocation8 + $0x70] ss:$8 sps:$4 sm:$0xff]   ;;  %v572_v27 = vld [vmem:[#allocation8 + $0x84] ss:$8 sps:$4 sm:$0xff]  }
  0x50   :  { %164 = vmatpush1.bf16.msra.mxu1 %v545_v10  ;;  %195 = vmatprep.mubr.bf16.mxu1 %v696_v0  ;;  %v574_v28 = vld [vmem:[#allocation8 + $0x80] ss:$8 sps:$4 sm:$0xff]   ;;  %v575_v29 = vld [vmem:[#allocation8 + $0x94] ss:$8 sps:$4 sm:$0xff]   ;;  %v577_v30 = vld [vmem:[#allocation8 + $0x90] ss:$8 sps:$4 sm:$0xff]  }
  0x51   :  { %428 = vmatprep.subr.bf16.mxu0 %v554_v13  ;;  %v578_v31 = vld [vmem:[#allocation8 + $0xa4] ss:$8 sps:$4 sm:$0xff]   ;;  %v580_v32 = vld [vmem:[#allocation8 + $0xa0] ss:$8 sps:$4 sm:$0xff]   ;;  %v581_v33 = vld [vmem:[#allocation8 + $0xb4] ss:$8 sps:$4 sm:$0xff]  }
  0x52   :  { %v583_v34 = vld [vmem:[#allocation8 + $0xb0] ss:$8 sps:$4 sm:$0xff]   ;;  %v584_v35 = vld [vmem:[#allocation8 + $0xc4] ss:$8 sps:$4 sm:$0xff]   ;;  %v586_v36 = vld [vmem:[#allocation8 + $0xc0] ss:$8 sps:$4 sm:$0xff]  }
  0x53   :  { %429 = vmatpush1.bf16.msra.mxu0 %v556_v15  ;;  %v587_v37 = vld [vmem:[#allocation8 + $0xd4] ss:$8 sps:$4 sm:$0xff]   ;;  %v589_v38 = vld [vmem:[#allocation8 + $0xd0] ss:$8 sps:$4 sm:$0xff]   ;;  %v590_v39 = vld [vmem:[#allocation8 + $0xe4] ss:$8 sps:$4 sm:$0xff]  }
  0x54   :  { %430 = vmatprep.subr.bf16.mxu0 %v557_v17  ;;  %v592_v40 = vld [vmem:[#allocation8 + $0xe0] ss:$8 sps:$4 sm:$0xff]   ;;  %v593_v41 = vld [vmem:[#allocation8 + $0xf4] ss:$8 sps:$4 sm:$0xff]   ;;  %v595_v42 = vld [vmem:[#allocation8 + $0xf0] ss:$8 sps:$4 sm:$0xff]  }
  0x55   :  { %v206_v44 = vshrl.u32 %v205_v43, 7  ;;  %v86_v50 = vld [vmem:[%s813_s5] ss:$2 sm:$0x3]  ;;  %vm487_vm3 = vcmask 7168  }
  0x56   :  { %v496_v2 = vld [vmem:[%s813_s5 + $0x1] ss:$2 sm:$0x3] }
  0x57   :  { %503 = vmatmul.mubr.msk.bf16.vlgmr.msra.gmra.mrb[4].mxu1 %vm159_vm2, %v83_v16  ;;  %431 = vmatpush1.bf16.msra.mxu0 %v559_v18  ;;  %v207_v49 = vsub.s32 0, %v206_v44  ;;  %v211_v51 = vsub.s32 1, %v206_v44  ;;  %v467_v5 = vld [vmem:[%s814_s6] sm:$0x3] }
  0x58   :  { %432 = vmatprep.subr.bf16.mxu0 %v560_v19  ;;  %v485_v19 = vstv %s815_s7 }
  0x59   :  { %v208_v52 = vrot.slane %v86_v50, %v207_v49  ;;  %v212_v54 = vrot.slane %v86_v50, %v211_v51  ;;  %v257_v3 = vrot.slane %v496_v2, %v207_v49  ;;  %v261_v4 = vrot.slane %v496_v2, %v211_v51 }
  0x5a   :  { %v472_v9 = vrot.slane %v467_v5, %v207_v49  ;;  %v476_v12 = vrot.slane %v467_v5, %v211_v51 }
  0x5b   :  { %433 = vmatpush1.bf16.msra.mxu0 %v562_v20 }
  0x5c   :  { %434 = vmatprep.subr.bf16.mxu0 %v563_v21 }
  0x5f   :  { %435 = vmatpush1.bf16.msra.mxu0 %v565_v22 }
  0x60   :  { %436 = vmatprep.subr.bf16.mxu0 %v566_v23 }
  0x63   :  { %437 = vmatpush1.bf16.msra.mxu0 %v568_v24 }
  0x64   :  { %438 = vmatprep.subr.bf16.mxu0 %v569_v25 }
  0x67   :  { %439 = vmatpush1.bf16.msra.mxu0 %v571_v26 }
  0x68   :  { %440 = vmatprep.subr.bf16.mxu0 %v572_v27 }
  0x6b   :  { %441 = vmatpush1.bf16.msra.mxu0 %v574_v28 }
  0x6c   :  { %442 = vmatprep.subr.bf16.mxu0 %v575_v29 }
  0x6f   :  { %443 = vmatpush1.bf16.msra.mxu0 %v577_v30 }
  0x70   :  { %444 = vmatprep.subr.bf16.mxu0 %v578_v31 }
  0x73   :  { %445 = vmatpush1.bf16.msra.mxu0 %v580_v32 }
  0x74   :  { %446 = vmatprep.subr.bf16.mxu0 %v581_v33 }
  0x77   :  { %447 = vmatpush1.bf16.msra.mxu0 %v583_v34 }
  0x78   :  { %448 = vmatprep.subr.bf16.mxu0 %v584_v35 }
  0x7b   :  { %449 = vmatpush1.bf16.msra.mxu0 %v586_v36 }
  0x7c   :  { %450 = vmatprep.subr.bf16.mxu0 %v587_v37 }
  0x7f   :  { %451 = vmatpush1.bf16.msra.mxu0 %v589_v38 }
  0x80   :  { %452 = vmatprep.subr.bf16.mxu0 %v590_v39 }
  0x83   :  { %453 = vmatpush1.bf16.msra.mxu0 %v592_v40 }
  0x84   :  { %454 = vmatprep.subr.bf16.mxu0 %v593_v41 }
  0x87   :  { %455 = vmatpush1.bf16.msra.mxu0 %v595_v42 }
 0x122   :  { %v142_v45 = vpop.f32.mrb[0].mxu1 }
 0x123   :  { %v144_v46 = vpop.f32.mrb[1].mxu1 }
 0x124   :  { %v146_v47 = vpop.f32.mrb[2].mxu1 }
 0x125   :  { %v147_v48 = vpop.f32.mrb[3].mxu1 }
 0x12a   :  { %v197_v53 = vpop.f32.mrb[4].mxu1 }
 0x12b   :  { %v198_v55 = vadd.f32 %v197_v53, %v142_v45  ;;  %v199_v56 = vpop.f32.mrb[5].mxu1 }
 0x12c   :  { %v200_v57 = vadd.f32 %v199_v56, %v144_v46  ;;  %v201_v58 = vpop.f32.mrb[6].mxu1 }
 0x12d   :  { %v215_v59 = vadd.f32 %v208_v52, %v198_v55  ;;  %v202_v60 = vpop.f32.mrb[7].mxu1 }
 0x12e   :  { %v216_v61 = vadd.f32 %v212_v54, %v200_v57 }
 0x12f   :  { %v217_v62 = vmax.f32 %v215_v59, 0.0 }
 0x130   :  { %v218_v63 = vmax.f32 %v216_v61, 0.0 }
 0x131   :  { %v219_v1 = vpack.c.bf16 %v217_v62, %v217_v62 }
 0x132   :  { %v220_v0 = vpack.c.bf16 %v218_v63, %v218_v63 }
 0x134   :  { %456 = vmatprep.mubr.bf16.mxu0 %v220_v0 }
 0x135   :  { %457 = vmatmul.mubr.bf16.vlgmr.msra.gmra.mrb[0].mxu0 %v219_v1 }
 0x208   :  { %v458_v6 = vpop.f32.mrb[0].mxu0 }
 0x209   :  { %v459_v7 = vadd.f32 %v458_v6, %v257_v3  ;;  %v460_v8 = vpop.f32.mrb[1].mxu0 }
 0x20a   :  { %v461_v10 = vadd.f32 %v460_v8, %v261_v4  ;;  %v462_v11 = vpop.f32.mrb[2].mxu0 }
 0x20b   :  { %v465_v13 = vmax.f32 %v459_v7, 0.0  ;;  %v463_v14 = vpop.f32.mrb[3].mxu0 }
 0x20c   :  { %v466_v15 = vmax.f32 %v461_v10, 0.0 }
 0x20d   :  { %v479_v16 = vmul.f32 %v472_v9, %v465_v13 }
 0x20e   :  { %v480_v17 = vmul.f32 %v476_v12, %v466_v15 }
 0x210   :  { %v481_v18 = vadd.f32 %v480_v17, %v479_v16 }
 0x212   :  { %482 = vadd.xlane.f32.xlu0 %v481_v18 }
 0x29f   :  { %v483_v20 = vpop.xlane.xlu0 %482 }
 0x2a0   :  { %v486_v21 = vadd.f32 %v485_v19, %v483_v20 }
 0x2a2   :  { %488 = vst.msk [vmem:[%s816_s8] sm:$0xff] %vm487_vm3, %v486_v21 }
 0x2a3   :  { %493 = vsyncpa [#allocation4], 1 }
 0x2a4   :  { %494 = vsyncpa [#allocation6], 1 }
 0x2a5   :  { %495 = vsyncpa [#allocation9], 1 }

</bundles_post_ra>
